<compile_context>
chip_gen: v6e
topology: v6e:2x2x1
jax: 0.10.0
libtpu: 0.0.40
codegen_flags: <defaults>
</compile_context>

<pallas_src>
import jax
import jax.numpy as jnp
from jax.experimental import pallas as pl
from jax.experimental.pallas import tpu as pltpu


def _pool_matrix(out_size: int, in_size: int, stride: int) -> jnp.ndarray:
    """P[i, j] = 1/stride if j in [i*stride, (i+1)*stride) else 0."""
    rows = jnp.arange(out_size)[:, None]
    cols = jnp.arange(in_size)[None, :]
    mask = (cols >= rows * stride) & (cols < (rows + 1) * stride)
    return mask.astype(jnp.float32) / float(stride)


def _pool_kernel(x_ref, p_ref, o_ref):
    # x_ref: (1, n_in, H*W)      -- all real channels of one batch element
    # p_ref: (H*W, h_out*w_out)  -- kron(Ph, Pw)^T, pre-transposed in wrapper
    # o_ref: (1, n_in, h_out*w_out)
    x = x_ref[0].astype(jnp.float32)                       # (n_in, H*W)
    pooled = jnp.dot(x, p_ref[...],
                     preferred_element_type=jnp.float32)   # (n_in, h_out*w_out)
    o_ref[0] = pooled.astype(o_ref.dtype)


def downsample_b(x: jnp.ndarray, n_out: int, stride: int) -> jnp.ndarray:
    """Pallas implementation of DownsampleB.forward (NCHW)."""
    N, n_in, H, W = x.shape
    expand_ratio = n_out // n_in
    h_out, w_out = H // stride, W // stride
    hw_in, hw_out = H * W, h_out * w_out

    # Combined pooling operator: pooled_flat = x_flat @ kron(Ph, Pw)^T.
    ph = _pool_matrix(h_out, H, stride)                    # (h_out, H)
    pw = _pool_matrix(w_out, W, stride)                    # (w_out, W)
    p_t = jnp.kron(ph, pw).T                               # (H*W, h_out*w_out)

    # Contiguous, lane-dense view of the input (free reshape in the wrapper).
    x2 = x.reshape(N, n_in, hw_in)

    pooled_flat = pl.pallas_call(
        _pool_kernel,
        out_shape=jax.ShapeDtypeStruct((N, n_in, hw_out), x.dtype),
        grid_spec=pltpu.PrefetchScalarGridSpec(
            num_scalar_prefetch=0,
            grid=(N,),
            in_specs=[
                pl.BlockSpec((1, n_in, hw_in), lambda n: (n, 0, 0)),
                pl.BlockSpec((hw_in, hw_out), lambda n: (0, 0)),
            ],
            out_specs=pl.BlockSpec((1, n_in, hw_out), lambda n: (n, 0, 0)),
        ),
        compiler_params=pltpu.CompilerParams(
            dimension_semantics=("parallel",)),
    )(x2, p_t)

    pooled = pooled_flat.reshape(N, n_in, h_out, w_out)

    # The torch `x.mul(0)` copies are zeros by definition — never compute them.
    if expand_ratio > 1:
        zeros = jnp.zeros((N, n_in * (expand_ratio - 1), h_out, w_out),
                          dtype=x.dtype)
        return jnp.concatenate([pooled, zeros], axis=1)
    return pooled


def downsample_b_ref(x: jnp.ndarray, n_out: int, stride: int) -> jnp.ndarray:
    """Pure-JAX reference matching the PyTorch module semantics."""
    N, n_in, H, W = x.shape
    expand_ratio = n_out // n_in
    h_out, w_out = H // stride, W // stride
    xr = x[:, :, : h_out * stride, : w_out * stride]
    xr = xr.reshape(N, n_in, h_out, stride, w_out, stride)
    pooled = xr.mean(axis=(3, 5))
    zeros = jnp.zeros_like(pooled)
    return jnp.concatenate([pooled] + [zeros] * (expand_ratio - 1), axis=1)


if __name__ == "__main__":
    # Module config: DownsampleB(nIn=4, nOut=8, stride=2)  (no learnable params)
    N, n_in, n_out, stride = 2, 4, 8, 2
    H = W = 16

    key = jax.random.PRNGKey(0)
    x = jax.random.normal(key, (N, n_in, H, W), dtype=jnp.float32)

    out = downsample_b(x, n_out, stride)
    out = jax.block_until_ready(out)

    ref = downsample_b_ref(x, n_out, stride)
    assert out.shape == ref.shape, (out.shape, ref.shape)
    assert jnp.allclose(out, ref, atol=1e-5, rtol=1e-5), "mismatch vs reference"

    print("KERNEL_OK")
</pallas_src>

<mosaic_0001>
module attributes {stable_mosaic.version = 11 : i64} {
  func.func @_pool_kernel(%arg0: i32, %arg1: memref<1x4x256xf32, #tpu.memory_space<vmem>>, %arg2: memref<256x64xf32, #tpu.memory_space<vmem>>, %arg3: memref<1x4x64xf32, #tpu.memory_space<vmem>>) attributes {dimension_semantics = [#tpu.dimension_semantics<parallel>], iteration_bounds = array<i64: 2>, scalar_prefetch = 0 : i64, scratch_operands = 0 : i64, tpu.core_type = #tpu.core_type<tc>, window_params = [{transform_indices = @transform_0, window_bounds = array<i64: 1, 4, 256>}, {pipeline_mode = #tpu.pipeline_mode<synchronous>, transform_indices = @transform_1, window_bounds = array<i64: 256, 64>}, {transform_indices = @transform_2, window_bounds = array<i64: 1, 4, 64>}]} {
    %c0 = arith.constant 0 : index
    %c0_0 = arith.constant 0 : index
    %c0_1 = arith.constant 0 : index
    %0 = vector.load %arg1[%c0, %c0_0, %c0_1] : memref<1x4x256xf32, #tpu.memory_space<vmem>>, vector<1x4x256xf32>
    %1 = vector.shape_cast %0 : vector<1x4x256xf32> to vector<4x256xf32>
    %c0_2 = arith.constant 0 : index
    %c0_3 = arith.constant 0 : index
    %2 = vector.load %arg2[%c0_2, %c0_3] : memref<256x64xf32, #tpu.memory_space<vmem>>, vector<256x64xf32>
    %cst = arith.constant dense<0.000000e+00> : vector<4x64xf32>
    %3 = tpu.matmul %1, %2, %cst {dimension_numbers = #tpu.dot_dimension_numbers<[1], [0], [0], [1], [0, 0, 1, 1], [], []>} : vector<4x256xf32>, vector<256x64xf32>, vector<4x64xf32> -> vector<4x64xf32>
    %c0_4 = arith.constant 0 : index
    %c0_5 = arith.constant 0 : index
    %c0_6 = arith.constant 0 : index
    %4 = vector.load %arg3[%c0_4, %c0_5, %c0_6] : memref<1x4x64xf32, #tpu.memory_space<vmem>>, vector<1x4x64xf32>
    %5 = vector.shape_cast %4 : vector<1x4x64xf32> to vector<4x64xf32>
    %6 = vector.shape_cast %3 : vector<4x64xf32> to vector<1x4x64xf32>
    tpu.vector_store %arg3[%c0_4, %c0_5, %c0_6], %6 {strides = array<i32>} : memref<1x4x64xf32, #tpu.memory_space<vmem>>, vector<1x4x64xf32>,
    return
  }
  func.func @transform_0(%arg0: i32) -> (i32, i32, i32) {
    %c0_i32 = arith.constant 0 : i32
    %c0_i32_0 = arith.constant 0 : i32
    %c0_i32_1 = arith.constant 0 : i32
    return %arg0, %c0_i32, %c0_i32_0 : i32, i32, i32
  }
  func.func @transform_1(%arg0: i32) -> (i32, i32) {
    %c0_i32 = arith.constant 0 : i32
    %c0_i32_0 = arith.constant 0 : i32
    %c0_i32_1 = arith.constant 0 : i32
    return %c0_i32, %c0_i32_0 : i32, i32
  }
  func.func @transform_2(%arg0: i32) -> (i32, i32, i32) {
    %c0_i32 = arith.constant 0 : i32
    %c0_i32_0 = arith.constant 0 : i32
    %c0_i32_1 = arith.constant 0 : i32
    return %arg0, %c0_i32, %c0_i32_0 : i32, i32, i32
  }
}

</mosaic_0001>

<bundles_post_ra>
// kernel: tpu_custom_call.1
= control target key start
LH: loop header
LB: loop body
LE: loop exit
PB: predicated region body
PF: predicated region fallthrough
CT: control target
= control target key end

     0   :  { %7 = vsyncpa [#allocation3], 0  ;;  %s671_s0 = inlined_call_operand.vmem [shape: f32[2,4,256], index: 0, kind: input, shape index: {}]   ;;  %s672_s1 = inlined_call_operand.vmem [shape: f32[256,64], index: 1, kind: input, shape index: {}]   ;;  %s673_s2 = inlined_call_operand.hbm [shape: f32[2,4,64], index: 2, kind: output, shape index: {}]  }
   0x1   :  { %9 = vsyncpa [#allocation3 + $0x1], 0  ;;  %s488_s9 = smov 0   ;;  %s490_s10 = smov 0  }
   0x2   :  { %s492_s11 = smov 0   ;;  %s494_s12 = smov 0  }
   0x3 LB: > { %s509_s13 = sadd.s32 4294967295, %s470_s12   ;;  %s323_s14 = sadd.s32 4294967294, %s470_s12   ;;  %s470_s12 = sphi %s494_s12, %s679_s12   ;;  %s466_s11 = sphi %s492_s11, %s678_s11   ;;  %s462_s10 = sphi %s490_s10, %s677_s10   ;;  %s458_s9 = sphi %s488_s9, %s676_s9  }
   0x4   : > { %s513_s15 = sadd.s32 1, %s470_s12   ;;  %s69_s16 = sadd.s32 1, %s466_s11 }
   0x5   : > { %s66_s17 = ssub.s32 %s470_s12, %s513_s15  ;;  %p79_p0 = scmp.ne.s32.totalorder %s466_s11, %s462_s10 }
   0x6   : > { %p67_p1 = scmp.eq.s32.totalorder %s66_s17, 0  ;;  %p80_p2 = scmp.eq.s32.totalorder %s509_s13, 1 }
   0x7   : > { %p85_p3 = scmp.ne.s32.totalorder %s462_s10, %s458_s9  ;;  %p86_p4 = scmp.eq.s32.totalorder %s323_s14, 1 }
   0x8   : > { %s524_s18 = scalar_select %p67_p1, %s466_s11, %s69_s16  }
   0x9   : > { %p526_p5 = por %p80_p2, %p79_p0  ;;  %p530_p6 = por %p86_p4, %p85_p3 }
   0xa   : > { %p326_p7 = scmp.ge.s32.totalorder %s470_s12, 1  ;;  %p115_p8 = scmp.lt.s32.totalorder %s470_s12, 3 }
   0xc   : > { %p116_p9 = pnand %p326_p7, %p115_p8 }
   0xd   : > { %p137_p10 = scmp.lt.s32.totalorder (!%p116_p9), %s509_s13, 1  ;;  %s134_s5 = sand.u32 (!%p116_p9), 1, %s462_s10  }
   0xe   : > { %119 = sbr.rel (%p116_p9) target bundleno = 262 (0x106), region = 28  ;;  %s327_s6 = sshll.u32 (!%p116_p9), %s134_s5, 2 }
   0xf   : > { %s331_s7 = sshll.u32 (!%p116_p9), %s509_s13, 6  ;;  %s251_s22 = scalar_lea.sflag (!%p116_p9), [#allocation3], %s134_s5 }
  0x10   : > { %s262_s21 = scalar_lea.hbm (!%p116_p9), %s673_s2, %s331_s7  ;;  %s472_s24 = smov (!%p116_p9), [#allocation2]  }
  0x11   : > { %s414_s25 = sshll.u32 (!%p116_p9), %s472_s24, 4  ;;  %s415_s25 = int_to_ptr.vmem [resolvable:$false] %s414_s25 }
  0x13   : > { %v174_v0 = vld [vmem:[%s672_s1 + $0xf8] sm:$0xff]  ;;  %v173_v2 = vld [vmem:[%s672_s1 + $0xf0] sm:$0xff]  ;;  %v172_v4 = vld [vmem:[%s672_s1 + $0xe8] sm:$0xff]  ;;  %s138_s3 = scalar_select %p137_p10, %s509_s13, 1  ;;  %vm248_vm0 = vcmask 519168  }
  0x14   : > { %v158_v1 = vld [vmem:[%s672_s1 + $0x78] sm:$0xff]  ;;  %335 = vmatprep.subr.mxu0 %v174_v0  ;;  %v157_v3 = vld [vmem:[%s672_s1 + $0x70] sm:$0xff]  ;;  %v156_v5 = vld [vmem:[%s672_s1 + $0x68] sm:$0xff]  ;;  %s416_s13 = scalar_lea.vmem %s415_s25, 128 }
  0x15   : > { %336 = vmatpush3.msra.mxu0 %v158_v1  ;;  %v171_v6 = vld [vmem:[%s672_s1 + $0xe0] sm:$0xff]  ;;  %s334_s8 = sshll.u32 %s138_s3, 3  ;;  %v170_v8 = vld [vmem:[%s672_s1 + $0xd8] sm:$0xff]  ;;  %v169_v10 = vld [vmem:[%s672_s1 + $0xd0] sm:$0xff] }
  0x16   : > { %337 = vmatprep.subr.mxu0 %v173_v2  ;;  %v155_v7 = vld [vmem:[%s672_s1 + $0x60] sm:$0xff]  ;;  %v154_v9 = vld [vmem:[%s672_s1 + $0x58] sm:$0xff]  ;;  %s141_s26 = scalar_lea.vmem %s671_s0, %s334_s8  ;;  %v153_v11 = vld [vmem:[%s672_s1 + $0x50] sm:$0xff]  ;;  %s136_s8 = scalar_lea.vmem [#allocation2], %s327_s6 }
  0x17   : > { %338 = vmatpush3.msra.mxu0 %v157_v3  ;;  %v168_v12 = vld [vmem:[%s672_s1 + $0xc8] sm:$0xff]  ;;  %v142_v13 = vld [vmem:[%s141_s26] sm:$0xff]  ;;  %v166_v18 = vld [vmem:[%s672_s1 + $0xb8] sm:$0xff]  ;;  %s264_s14 = sshll.u32 %s136_s8, 4  ;;  %s265_s14 = int_to_ptr.vmem [resolvable:$true] %s264_s14 }
  0x18   : > { %339 = vmatprep.subr.mxu0 %v172_v4  ;;  %v152_v14 = vld [vmem:[%s672_s1 + $0x48] sm:$0xff]  ;;  %v176_v15 = vcombine.high %v142_v13, %v142_v13  ;;  %v167_v16 = vld [vmem:[%s672_s1 + $0xc0] sm:$0xff]  ;;  %v150_v19 = vld [vmem:[%s672_s1 + $0x38] sm:$0xff]  ;;  %s410_s23 = scalar_lea.vmem %s265_s14, 64  ;;  %p417_p0 = scmp.lt.s32.totalorder %s265_s14, %s415_s25 }
  0x19   : > { %340 = vmatpush3.msra.mxu0 %v156_v5  ;;  %v151_v17 = vld [vmem:[%s672_s1 + $0x40] sm:$0xff]  ;;  %v165_v20 = vld [vmem:[%s672_s1 + $0xb0] sm:$0xff]  ;;  %v164_v22 = vld [vmem:[%s672_s1 + $0xa8] sm:$0xff]  ;;  %p411_p11 = scmp.ne.s32.totalorder %s265_s14, %s410_s23  ;;  %p418_p1 = scmp.lt.s32.totalorder %s416_s13, %s410_s23 }
  0x1a   : > { %341 = vmatprep.subr.mxu0 %v171_v6  ;;  %242 = vmatprep.mubr.f32.mxu0 %v176_v15  ;;  %v149_v21 = vld [vmem:[%s672_s1 + $0x30] sm:$0xff]  ;;  %v148_v23 = vld [vmem:[%s672_s1 + $0x28] sm:$0xff]  ;;  %v163_v24 = vld [vmem:[%s672_s1 + $0xa0] sm:$0xff] }
  0x1b   : > { %342 = vmatpush3.msra.mxu0 %v155_v7  ;;  %v147_v25 = vld [vmem:[%s672_s1 + $0x20] sm:$0xff]  ;;  %v162_v26 = vld [vmem:[%s672_s1 + $0x98] sm:$0xff]  ;;  %v161_v28 = vld [vmem:[%s672_s1 + $0x90] sm:$0xff]  ;;  %p412_p12 = pnand %p411_p11, %p526_p5  ;;  %p419_p2 = por %p418_p1, %p417_p0 }
  0x1c   : > { %343 = vmatprep.subr.mxu0 %v170_v8  ;;  %v146_v27 = vld [vmem:[%s672_s1 + $0x18] sm:$0xff]  ;;  %v145_v29 = vld [vmem:[%s672_s1 + $0x10] sm:$0xff]  ;;  %v160_v30 = vld [vmem:[%s672_s1 + $0x88] sm:$0xff] }
  0x1d   : > { %344 = vmatpush3.msra.mxu0 %v154_v9  ;;  %v144_v31 = vld [vmem:[%s672_s1 + $0x8] sm:$0xff]  ;;  %v159_v32 = vld [vmem:[%s672_s1 + $0x80] sm:$0xff]  ;;  %p413_p13 = pneg %p412_p12 }
  0x1e   : > { %345 = vmatprep.subr.mxu0 %v169_v10  ;;  %v143_v33 = vld [vmem:[%s672_s1] sm:$0xff] }
  0x1f   : > { %346 = vmatpush3.msra.mxu0 %v153_v11  ;;  %p420_p3 = pnand %p419_p2, %p413_p13 }
  0x20   : > { %347 = vmatprep.subr.mxu0 %v168_v12 }
  0x21   : > { %348 = vmatpush3.msra.mxu0 %v152_v14 }
  0x22   : > { %349 = vmatprep.subr.mxu0 %v167_v16 }
  0x23   : > { %350 = vmatpush3.msra.mxu0 %v151_v17 }
  0x24   : > { %351 = vmatprep.subr.mxu0 %v166_v18 }
  0x25   : > { %352 = vmatpush3.msra.mxu0 %v150_v19 }
  0x26   : > { %353 = vmatprep.subr.mxu0 %v165_v20 }
  0x27   : > { %354 = vmatpush3.msra.mxu0 %v149_v21 }
  0x28   : > { %355 = vmatprep.subr.mxu0 %v164_v22 }
  0x29   : > { %356 = vmatpush3.msra.mxu0 %v148_v23 }
  0x2a   : > { %357 = vmatprep.subr.mxu0 %v163_v24 }
  0x2b   : > { %358 = vmatpush3.msra.mxu0 %v147_v25 }
  0x2c   : > { %359 = vmatprep.subr.mxu0 %v162_v26 }
  0x2d   : > { %360 = vmatpush3.msra.mxu0 %v146_v27 }
  0x2e   : > { %361 = vmatprep.subr.mxu0 %v161_v28 }
  0x2f   : > { %362 = vmatpush3.msra.mxu0 %v145_v29 }
  0x30   : > { %363 = vmatprep.subr.mxu0 %v160_v30 }
  0x31   : > { %364 = vmatpush3.msra.mxu0 %v144_v31 }
  0x32   : > { %365 = vmatprep.subr.mxu0 %v159_v32 }
  0x33   : > { %366 = vmatpush3.msra.mxu0 %v143_v33 }
  0x34   : > { %243 = vmatmul.mubr.f32.vlgmr.msra.gmra.mxu0 %v142_v13 }
  0xf4   : > { %v367_v34 = vpop.f32.mrf.mxu0 }
  0xf6   : > { %v368_v35 = vpop.f32.mrf.mxu0 }
  0xf7   : > { %v369_v36 = vadd.f32 %v368_v35, %v367_v34 }
  0xf9   : > { %249 = vst.msk [vmem:[%s136_s8] sm:$0xf] %vm248_vm0, %v369_v36 }
  0xfa   : > { %423 = shalt.err (!%p420_p3)
}
  0xfb   : > { %s424_s26 = scalar_lea.hbm %s262_s21, 64  ;;  %s428_s29 = scalar_lea.hbm %s673_s2, 128 }
  0xfc   : > { %p425_p4 = scmp.ne.s32.totalorder %s262_s21, %s424_s26  ;;  %p429_p9 = scmp.lt.s32.totalorder %s262_s21, %s673_s2 }
  0xfd   : > { %p430_p10 = scmp.lt.s32.totalorder %s428_s29, %s424_s26 }
  0xfe   : > { %p426_p7 = pnand %p425_p4, %p526_p5 }
  0xff   : > { %p431_p11 = por %p430_p10, %p429_p9 }
 0x100   : > { %p427_p8 = pneg %p426_p7 }
 0x102   : > { %p432_p12 = pnand %p431_p11, %p427_p8 }
 0x104   : > { %435 = shalt.err (!%p432_p12)
}
 0x105   : > { %370 = dma.vmem_to_hbm [thread:$0]  (%p526_p5), %s265_s14, 64, %s262_s21, %s251_s22  }
 0x106 PF: > { %p376_p13 = scmp.ge.s32.totalorder %s470_s12, 2  ;;  %s276_s4 = sand.u32 1, %s458_s9  }
 0x107   : > { %s277_s5 = scalar_lea.sflag [#allocation3], %s276_s4 }
 0x108   : > { %p373_p0 = pnand %p376_p13, %p530_p6 }
 0x10a   : > { %p374_p1 = pneg %p373_p0 }
 0x10c   : > { %453 = dma.done.wait (%p374_p1), %s277_s5, 64  }
 0x10d   : > { %455 = vsyncadd (%p374_p1), %s277_s5, 4294967232  ;;  %p12_p2 = scmp.ge.s32.totalorder %s513_s15, 4   ;;  %s676_s9 = smov %s462_s10 }
 0x10e   : > { %s677_s10 = smov %s466_s11  ;;  %s678_s11 = smov %s524_s18 }
 0x10f   : > { %s679_s12 = smov %s513_s15  ;;  %14 = sbr.rel (!%p12_p2) target bundleno = 3 (0x3), region = 63 }
 0x114   :  { %282 = vsyncpa [#allocation3], 1 }
 0x115   :  { %284 = vsyncpa [#allocation3 + $0x1], 1 }

</bundles_post_ra>
